<compile_context>
chip_gen: v6e
topology: v6e:2x2x1
jax: 0.10.0
libtpu: 0.0.40
codegen_flags: <defaults>
</compile_context>

<pallas_src>
import jax
import jax.numpy as jnp
import numpy as np
from jax import lax
from jax.experimental import pallas as pl
from jax.experimental.pallas import tpu as pltpu


def conv_module_forward(x_nchw, weight_oihw, bn_gamma, bn_beta, bn_mean, bn_var,
                        *, padding=1, eps=1e-5, compute_dtype=jnp.bfloat16):
    """ConvModule forward: Conv2d(bias=False) -> BatchNorm2d(eval) -> ReLU."""
    N, Cin, H, W = x_nchw.shape
    Cout, Cin_w, KH, KW = weight_oihw.shape
    assert Cin_w == Cin
    # This implementation covers the ConvModule config used here:
    # stride=1, dilation=1, groups=1, odd 'same' kernel, padding_mode='zeros'.
    assert KH % 2 == 1 and KW % 2 == 1
    assert 2 * padding == KH - 1 and 2 * padding == KW - 1

    Hp, Wp = H + 2 * padding, W + 2 * padding
    # Per-image flat length, padded to a lane-aligned multiple of 128 so every
    # block's last dim is vreg-aligned (no masked stores, friendly rolls).
    Li = ((Hp * Wp + 127) // 128) * 128

    # ---- input layout glue (single relayout pass; NO im2col in HBM) -------
    xt = jnp.transpose(x_nchw, (1, 0, 2, 3))                       # (Cin,N,H,W)
    xp = jnp.pad(xt, ((0, 0), (0, 0), (padding, padding), (padding, padding)))
    xf = xp.reshape(Cin, N, Hp * Wp)
    xf = jnp.pad(xf, ((0, 0), (0, 0), (0, Li - Hp * Wp)))          # lane-pad tail
    xf = xf.reshape(Cin, N * Li).astype(compute_dtype)             # (Cin, N*Li)

    # ---- weights: per-tap (KH*KW, Cout, Cin), BatchNorm scale folded in ----
    inv_std = 1.0 / jnp.sqrt(bn_var + eps)
    scale = bn_gamma * inv_std                                      # (Cout,)
    shift = (bn_beta - bn_mean * scale).reshape(Cout, 1).astype(jnp.float32)
    w_taps = jnp.transpose(weight_oihw, (2, 3, 0, 1)).reshape(KH * KW, Cout, Cin)
    w_taps = (w_taps * scale[None, :, None]).astype(compute_dtype)

    # Static flat-index offset of each tap in the padded-image frame.
    offs = [(kh - padding) * Wp + (kw - padding)
            for kh in range(KH) for kw in range(KW)]

    def kernel(w_ref, x_ref, shift_ref, o_ref):
        # w_ref:     (KH*KW, Cout, Cin)  BN-scale-folded weights (resident)
        # x_ref:     (Cin, Li)           one zero-padded image, flat, lane-dense
        # shift_ref: (Cout, 1)           fused BatchNorm shift (f32)
        # o_ref:     (Cout, Li)          lane-dense output slab (padded frame)
        x = x_ref[...]
        acc = jnp.zeros((Cout, Li), jnp.float32)
        for t, off in enumerate(offs):
            # Shifted view of the padded image: xs[p] = x[p + off]. Wrap-around
            # only affects discarded border/pad-tail outputs (see header note).
            xs = x if off == 0 else pltpu.roll(x, shift=(-off) % Li, axis=1)
            acc = acc + jnp.dot(w_ref[t], xs,
                                preferred_element_type=jnp.float32)
        o_ref[...] = jnp.maximum(acc + shift_ref[...], 0.0).astype(o_ref.dtype)

    out_flat = pl.pallas_call(
        kernel,
        out_shape=jax.ShapeDtypeStruct((Cout, N * Li), x_nchw.dtype),
        grid_spec=pl.GridSpec(
            grid=(N,),                                   # one image per step
            in_specs=[
                pl.BlockSpec((KH * KW, Cout, Cin), lambda i: (0, 0, 0)),  # weights
                pl.BlockSpec((Cin, Li), lambda i: (0, i)),                # image i
                pl.BlockSpec((Cout, 1), lambda i: (0, 0)),                # BN shift
            ],
            out_specs=pl.BlockSpec((Cout, Li), lambda i: (0, i)),
        ),
        compiler_params=pltpu.CompilerParams(
            dimension_semantics=("parallel",)),          # megacore-shardable
    )(w_taps, xf, shift)

    # Strip the lane-pad tail and the padded border ring; back to NCHW to match
    # the PyTorch module's output layout (pure layout glue, see header TODO).
    out = out_flat.reshape(Cout, N, Li)[:, :, :Hp * Wp]
    out = out.reshape(Cout, N, Hp, Wp)[:, :, padding:Hp - padding,
                                       padding:Wp - padding]
    return jnp.transpose(out, (1, 0, 2, 3))


def _reference(x_nchw, weight_oihw, bn_gamma, bn_beta, bn_mean, bn_var,
               *, padding=1, eps=1e-5):
    """Pure-JAX reference: conv2d -> BN(eval) -> ReLU."""
    y = lax.conv_general_dilated(
        x_nchw, weight_oihw, window_strides=(1, 1),
        padding=((padding, padding), (padding, padding)),
        dimension_numbers=('NCHW', 'OIHW', 'NCHW'))
    inv_std = 1.0 / jnp.sqrt(bn_var + eps)
    scale = (bn_gamma * inv_std)[None, :, None, None]
    shift = (bn_beta - bn_mean * bn_gamma * inv_std)[None, :, None, None]
    return jnp.maximum(y * scale + shift, 0.0)


if __name__ == "__main__":
    N, Cin, H, W = 2, 4, 16, 16
    Cout, KH, KW = 8, 3, 3

    key = jax.random.PRNGKey(0)
    kx, kw = jax.random.split(key)

    x = jax.random.normal(kx, (N, Cin, H, W), dtype=jnp.float32)

    # kaiming_init (mmcv default: fan_out, relu, normal), deterministic
    fan_out = Cout * KH * KW
    std = float(np.sqrt(2.0 / fan_out))
    weight = jax.random.normal(kw, (Cout, Cin, KH, KW), dtype=jnp.float32) * std

    # BatchNorm params: constant_init(weight=1, bias=0); fresh running stats
    bn_gamma = jnp.ones((Cout,), jnp.float32)
    bn_beta = jnp.zeros((Cout,), jnp.float32)
    bn_mean = jnp.zeros((Cout,), jnp.float32)
    bn_var = jnp.ones((Cout,), jnp.float32)

    ref = _reference(x, weight, bn_gamma, bn_beta, bn_mean, bn_var)

    # Exact-semantics anchor: f32 operands, tight tolerance.
    out_f32 = conv_module_forward(x, weight, bn_gamma, bn_beta, bn_mean, bn_var,
                                  compute_dtype=jnp.float32)
    out_f32 = jax.block_until_ready(out_f32)
    np.testing.assert_allclose(np.asarray(out_f32), np.asarray(ref),
                               rtol=1e-4, atol=1e-4)

    # Default (perf) path: bf16 operands, f32 accumulation; loosened tolerance.
    out_bf16 = conv_module_forward(x, weight, bn_gamma, bn_beta, bn_mean, bn_var)
    out_bf16 = jax.block_until_ready(out_bf16)
    np.testing.assert_allclose(np.asarray(out_bf16), np.asarray(ref),
                               rtol=5e-2, atol=5e-2)

    print("KERNEL_OK")
</pallas_src>

<mosaic_0001>
module attributes {stable_mosaic.version = 11 : i64} {
  func.func @kernel(%arg0: i32, %arg1: memref<9x8x4xf32, #tpu.memory_space<vmem>>, %arg2: memref<4x384xf32, #tpu.memory_space<vmem>>, %arg3: memref<8x1xf32, #tpu.memory_space<vmem>>, %arg4: memref<8x384xf32, #tpu.memory_space<vmem>>) attributes {dimension_semantics = [#tpu.dimension_semantics<parallel>], iteration_bounds = array<i64: 2>, scalar_prefetch = 0 : i64, scratch_operands = 0 : i64, tpu.core_type = #tpu.core_type<tc>, window_params = [{pipeline_mode = #tpu.pipeline_mode<synchronous>, transform_indices = @transform_0, window_bounds = array<i64: 9, 8, 4>}, {transform_indices = @transform_1, window_bounds = array<i64: 4, 384>}, {pipeline_mode = #tpu.pipeline_mode<synchronous>, transform_indices = @transform_2, window_bounds = array<i64: 8, 1>}, {transform_indices = @transform_3, window_bounds = array<i64: 8, 384>}]} {
    %c0 = arith.constant 0 : index
    %c0_0 = arith.constant 0 : index
    %0 = vector.load %arg2[%c0, %c0_0] : memref<4x384xf32, #tpu.memory_space<vmem>>, vector<4x384xf32>
    %cst = arith.constant 0.000000e+00 : f32
    %1 = vector.broadcast %cst : f32 to vector<8x384xf32>
    %c19_i32 = arith.constant 19 : i32
    %2 = tpu.dynamic_rotate %0 by %c19_i32 dim 1 : vector<4x384xf32>, i32 -> vector<4x384xf32>
    %c0_1 = arith.constant 0 : index
    %c0_2 = arith.constant 0 : index
    %c0_3 = arith.constant 0 : index
    %3 = vector.load %arg1[%c0_1, %c0_2, %c0_3] : memref<9x8x4xf32, #tpu.memory_space<vmem>>, vector<1x8x4xf32>
    %4 = vector.shape_cast %3 : vector<1x8x4xf32> to vector<8x4xf32>
    %cst_4 = arith.constant dense<0.000000e+00> : vector<8x384xf32>
    %5 = tpu.matmul %4, %2, %cst_4 {dimension_numbers = #tpu.dot_dimension_numbers<[1], [0], [0], [1], [0, 0, 1, 1], [], []>} : vector<8x4xf32>, vector<4x384xf32>, vector<8x384xf32> -> vector<8x384xf32>
    %6 = arith.addf %1, %5 : vector<8x384xf32>
    %c18_i32 = arith.constant 18 : i32
    %7 = tpu.dynamic_rotate %0 by %c18_i32 dim 1 : vector<4x384xf32>, i32 -> vector<4x384xf32>
    %c1 = arith.constant 1 : index
    %c0_5 = arith.constant 0 : index
    %c0_6 = arith.constant 0 : index
    %8 = vector.load %arg1[%c1, %c0_5, %c0_6] : memref<9x8x4xf32, #tpu.memory_space<vmem>>, vector<1x8x4xf32>
    %9 = vector.shape_cast %8 : vector<1x8x4xf32> to vector<8x4xf32>
    %cst_7 = arith.constant dense<0.000000e+00> : vector<8x384xf32>
    %10 = tpu.matmul %9, %7, %cst_7 {dimension_numbers = #tpu.dot_dimension_numbers<[1], [0], [0], [1], [0, 0, 1, 1], [], []>} : vector<8x4xf32>, vector<4x384xf32>, vector<8x384xf32> -> vector<8x384xf32>
    %11 = arith.addf %6, %10 : vector<8x384xf32>
    %c17_i32 = arith.constant 17 : i32
    %12 = tpu.dynamic_rotate %0 by %c17_i32 dim 1 : vector<4x384xf32>, i32 -> vector<4x384xf32>
    %c2 = arith.constant 2 : index
    %c0_8 = arith.constant 0 : index
    %c0_9 = arith.constant 0 : index
    %13 = vector.load %arg1[%c2, %c0_8, %c0_9] : memref<9x8x4xf32, #tpu.memory_space<vmem>>, vector<1x8x4xf32>
    %14 = vector.shape_cast %13 : vector<1x8x4xf32> to vector<8x4xf32>
    %cst_10 = arith.constant dense<0.000000e+00> : vector<8x384xf32>
    %15 = tpu.matmul %14, %12, %cst_10 {dimension_numbers = #tpu.dot_dimension_numbers<[1], [0], [0], [1], [0, 0, 1, 1], [], []>} : vector<8x4xf32>, vector<4x384xf32>, vector<8x384xf32> -> vector<8x384xf32>
    %16 = arith.addf %11, %15 : vector<8x384xf32>
    %c1_i32 = arith.constant 1 : i32
    %17 = tpu.dynamic_rotate %0 by %c1_i32 dim 1 : vector<4x384xf32>, i32 -> vector<4x384xf32>
    %c3 = arith.constant 3 : index
    %c0_11 = arith.constant 0 : index
    %c0_12 = arith.constant 0 : index
    %18 = vector.load %arg1[%c3, %c0_11, %c0_12] : memref<9x8x4xf32, #tpu.memory_space<vmem>>, vector<1x8x4xf32>
    %19 = vector.shape_cast %18 : vector<1x8x4xf32> to vector<8x4xf32>
    %cst_13 = arith.constant dense<0.000000e+00> : vector<8x384xf32>
    %20 = tpu.matmul %19, %17, %cst_13 {dimension_numbers = #tpu.dot_dimension_numbers<[1], [0], [0], [1], [0, 0, 1, 1], [], []>} : vector<8x4xf32>, vector<4x384xf32>, vector<8x384xf32> -> vector<8x384xf32>
    %21 = arith.addf %16, %20 : vector<8x384xf32>
    %c4 = arith.constant 4 : index
    %c0_14 = arith.constant 0 : index
    %c0_15 = arith.constant 0 : index
    %22 = vector.load %arg1[%c4, %c0_14, %c0_15] : memref<9x8x4xf32, #tpu.memory_space<vmem>>, vector<1x8x4xf32>
    %23 = vector.shape_cast %22 : vector<1x8x4xf32> to vector<8x4xf32>
    %cst_16 = arith.constant dense<0.000000e+00> : vector<8x384xf32>
    %24 = tpu.matmul %23, %0, %cst_16 {dimension_numbers = #tpu.dot_dimension_numbers<[1], [0], [0], [1], [0, 0, 1, 1], [], []>} : vector<8x4xf32>, vector<4x384xf32>, vector<8x384xf32> -> vector<8x384xf32>
    %25 = arith.addf %21, %24 : vector<8x384xf32>
    %c383_i32 = arith.constant 383 : i32
    %26 = tpu.dynamic_rotate %0 by %c383_i32 dim 1 : vector<4x384xf32>, i32 -> vector<4x384xf32>
    %c5 = arith.constant 5 : index
    %c0_17 = arith.constant 0 : index
    %c0_18 = arith.constant 0 : index
    %27 = vector.load %arg1[%c5, %c0_17, %c0_18] : memref<9x8x4xf32, #tpu.memory_space<vmem>>, vector<1x8x4xf32>
    %28 = vector.shape_cast %27 : vector<1x8x4xf32> to vector<8x4xf32>
    %cst_19 = arith.constant dense<0.000000e+00> : vector<8x384xf32>
    %29 = tpu.matmul %28, %26, %cst_19 {dimension_numbers = #tpu.dot_dimension_numbers<[1], [0], [0], [1], [0, 0, 1, 1], [], []>} : vector<8x4xf32>, vector<4x384xf32>, vector<8x384xf32> -> vector<8x384xf32>
    %30 = arith.addf %25, %29 : vector<8x384xf32>
    %c367_i32 = arith.constant 367 : i32
    %31 = tpu.dynamic_rotate %0 by %c367_i32 dim 1 : vector<4x384xf32>, i32 -> vector<4x384xf32>
    %c6 = arith.constant 6 : index
    %c0_20 = arith.constant 0 : index
    %c0_21 = arith.constant 0 : index
    %32 = vector.load %arg1[%c6, %c0_20, %c0_21] : memref<9x8x4xf32, #tpu.memory_space<vmem>>, vector<1x8x4xf32>
    %33 = vector.shape_cast %32 : vector<1x8x4xf32> to vector<8x4xf32>
    %cst_22 = arith.constant dense<0.000000e+00> : vector<8x384xf32>
    %34 = tpu.matmul %33, %31, %cst_22 {dimension_numbers = #tpu.dot_dimension_numbers<[1], [0], [0], [1], [0, 0, 1, 1], [], []>} : vector<8x4xf32>, vector<4x384xf32>, vector<8x384xf32> -> vector<8x384xf32>
    %35 = arith.addf %30, %34 : vector<8x384xf32>
    %c366_i32 = arith.constant 366 : i32
    %36 = tpu.dynamic_rotate %0 by %c366_i32 dim 1 : vector<4x384xf32>, i32 -> vector<4x384xf32>
    %c7 = arith.constant 7 : index
    %c0_23 = arith.constant 0 : index
    %c0_24 = arith.constant 0 : index
    %37 = vector.load %arg1[%c7, %c0_23, %c0_24] : memref<9x8x4xf32, #tpu.memory_space<vmem>>, vector<1x8x4xf32>
    %38 = vector.shape_cast %37 : vector<1x8x4xf32> to vector<8x4xf32>
    %cst_25 = arith.constant dense<0.000000e+00> : vector<8x384xf32>
    %39 = tpu.matmul %38, %36, %cst_25 {dimension_numbers = #tpu.dot_dimension_numbers<[1], [0], [0], [1], [0, 0, 1, 1], [], []>} : vector<8x4xf32>, vector<4x384xf32>, vector<8x384xf32> -> vector<8x384xf32>
    %40 = arith.addf %35, %39 : vector<8x384xf32>
    %c365_i32 = arith.constant 365 : i32
    %41 = tpu.dynamic_rotate %0 by %c365_i32 dim 1 : vector<4x384xf32>, i32 -> vector<4x384xf32>
    %c8 = arith.constant 8 : index
    %c0_26 = arith.constant 0 : index
    %c0_27 = arith.constant 0 : index
    %42 = vector.load %arg1[%c8, %c0_26, %c0_27] : memref<9x8x4xf32, #tpu.memory_space<vmem>>, vector<1x8x4xf32>
    %43 = vector.shape_cast %42 : vector<1x8x4xf32> to vector<8x4xf32>
    %cst_28 = arith.constant dense<0.000000e+00> : vector<8x384xf32>
    %44 = tpu.matmul %43, %41, %cst_28 {dimension_numbers = #tpu.dot_dimension_numbers<[1], [0], [0], [1], [0, 0, 1, 1], [], []>} : vector<8x4xf32>, vector<4x384xf32>, vector<8x384xf32> -> vector<8x384xf32>
    %45 = arith.addf %40, %44 : vector<8x384xf32>
    %c0_29 = arith.constant 0 : index
    %c0_30 = arith.constant 0 : index
    %46 = vector.load %arg3[%c0_29, %c0_30] : memref<8x1xf32, #tpu.memory_space<vmem>>, vector<8x1xf32>
    %47 = vector.broadcast %46 : vector<8x1xf32> to vector<8x384xf32>
    %48 = arith.addf %45, %47 : vector<8x384xf32>
    %cst_31 = arith.constant 0.000000e+00 : f32
    %49 = vector.broadcast %cst_31 : f32 to vector<8x384xf32>
    %50 = arith.maximumf %48, %49 : vector<8x384xf32>
    %c0_32 = arith.constant 0 : index
    %c0_33 = arith.constant 0 : index
    %51 = vector.load %arg4[%c0_32, %c0_33] : memref<8x384xf32, #tpu.memory_space<vmem>>, vector<8x384xf32>
    tpu.vector_store %arg4[%c0_32, %c0_33], %50 {strides = array<i32>} : memref<8x384xf32, #tpu.memory_space<vmem>>, vector<8x384xf32>,
    return
  }
  func.func @transform_0(%arg0: i32) -> (i32, i32, i32) {
    %c0_i32 = arith.constant 0 : i32
    %c0_i32_0 = arith.constant 0 : i32
    %c0_i32_1 = arith.constant 0 : i32
    %c0_i32_2 = arith.constant 0 : i32
    return %c0_i32, %c0_i32_0, %c0_i32_1 : i32, i32, i32
  }
  func.func @transform_1(%arg0: i32) -> (i32, i32) {
    %c0_i32 = arith.constant 0 : i32
    %c0_i32_0 = arith.constant 0 : i32
    return %c0_i32, %arg0 : i32, i32
  }
  func.func @transform_2(%arg0: i32) -> (i32, i32) {
    %c0_i32 = arith.constant 0 : i32
    %c0_i32_0 = arith.constant 0 : i32
    %c0_i32_1 = arith.constant 0 : i32
    return %c0_i32, %c0_i32_0 : i32, i32
  }
  func.func @transform_3(%arg0: i32) -> (i32, i32) {
    %c0_i32 = arith.constant 0 : i32
    %c0_i32_0 = arith.constant 0 : i32
    return %c0_i32, %arg0 : i32, i32
  }
}

</mosaic_0001>

<bundles_post_ra>
// kernel: tpu_custom_call.1
= control target key start
LH: loop header
LB: loop body
LE: loop exit
PB: predicated region body
PF: predicated region fallthrough
CT: control target
= control target key end

     0   :  { %8 = vsyncpa [#allocation3], 0  ;;  %s2287_s0 = inlined_call_operand.vmem [shape: f32[9,8,4], index: 0, kind: input, shape index: {}]   ;;  %s2288_s1 = inlined_call_operand.vmem [shape: f32[4,768], index: 1, kind: input, shape index: {}]   ;;  %s2289_s2 = inlined_call_operand.vmem [shape: f32[8,1], index: 2, kind: input, shape index: {}]   ;;  %s2290_s3 = inlined_call_operand.hbm [shape: f32[8,768], index: 3, kind: output, shape index: {}]  }
   0x1   :  { %10 = vsyncpa [#allocation3 + $0x1], 0  ;;  %s2035_s12 = smov 0   ;;  %s2037_s13 = smov 0  }
   0x2   :  { %s2039_s14 = smov 0   ;;  %s2041_s15 = smov 0  }
   0x3 LB: > { %s2056_s16 = sadd.s32 4294967295, %s2001_s15   ;;  %s1763_s17 = sadd.s32 4294967294, %s2001_s15   ;;  %s2001_s15 = sphi %s2041_s15, %s2296_s15   ;;  %s1997_s14 = sphi %s2039_s14, %s2295_s14   ;;  %s1993_s13 = sphi %s2037_s13, %s2294_s13   ;;  %s1989_s12 = sphi %s2035_s12, %s2293_s12  }
   0x4   : > { %s2060_s18 = sadd.s32 1, %s2001_s15   ;;  %s91_s19 = sadd.s32 1, %s1997_s14 }
   0x5   : > { %s88_s20 = ssub.s32 %s2001_s15, %s2060_s18  ;;  %p101_p0 = scmp.ne.s32.totalorder %s1997_s14, %s1993_s13 }
   0x6   : > { %p89_p1 = scmp.eq.s32.totalorder %s88_s20, 0  ;;  %p102_p2 = scmp.eq.s32.totalorder %s2056_s16, 1 }
   0x7   : > { %p107_p3 = scmp.ne.s32.totalorder %s1993_s13, %s1989_s12  ;;  %p108_p4 = scmp.eq.s32.totalorder %s1763_s17, 1 }
   0x8   : > { %s2071_s21 = scalar_select %p89_p1, %s1997_s14, %s91_s19  }
   0x9   : > { %p2073_p5 = por %p102_p2, %p101_p0  ;;  %p2077_p6 = por %p108_p4, %p107_p3 }
   0xa   : > { %p1766_p7 = scmp.ge.s32.totalorder %s2001_s15, 1  ;;  %p141_p8 = scmp.lt.s32.totalorder %s2001_s15, 3 }
   0xc   : > { %p142_p9 = pnand %p1766_p7, %p141_p8 }
   0xd   : > { %s165_s24 = smul.u32 (!%p142_p9), 3, %s2056_s16  ;;  %s2005_s29 = smov (!%p142_p9), 18  }
   0xe   : > { %145 = sbr.rel (%p142_p9) target bundleno = 399 (0x18f), region = 32  ;;  %s2006_s30 = smov (!%p142_p9), 19  }
   0xf   : > { %p166_p10 = scmp.lt.s32.totalorder (!%p142_p9), %s165_s24, 5  ;;  %s2007_s4 = smov (!%p142_p9), 17  }
  0x10   : > { %s2008_s5 = smov (!%p142_p9), 1   ;;  %s2009_s6 = smov (!%p142_p9), 127  }
  0x11   : > { %s2010_s7 = smov (!%p142_p9), 111   ;;  %s2012_s8 = smov (!%p142_p9), 110  }
  0x12   : > { %s2013_s9 = smov (!%p142_p9), 109   ;;  %s162_s17 = sand.u32 (!%p142_p9), 1, %s1993_s13  }
  0x13   : > { %v2003_v0 = vmov 0.0   ;;  %s2298_s24 = smov (!%p166_p10, %s165_s24), 5  ;;  %vm2004_vm0 = vmmov 0   ;;  %v2011_v4 = vmov 0   ;;  %v1674_v5 = vld [vmem:[%s2289_s2] sm:$0xff]  ;;  %v184_v6 = vlaneseq  ;;  %v1768_v14 = vld [vmem:[%s2287_s0 + $0x8] sm:$0xff] }
  0x14   : > { %1843 = vmatprep.subr.mxu1 %v2003_v0  ;;  %281 = vmatprep.mubr.f32.mxu0 %v2003_v0  ;;  %s1767_s25 = sshll.u32 %s2298_s24, 2  ;;  %vm207_vm2 = vcmask 1043456   ;;  %vm203_vm3 = vcmask 31744   ;;  %v190_v21 = vld [vmem:[%s2287_s0] sm:$0xff]  ;;  %v1779_v27 = vld [vmem:[%s2287_s0 + $0x10] sm:$0xff]  ;;  %v1785_v32 = vld [vmem:[%s2287_s0 + $0x18] sm:$0xff] }
  0x15   : > { %1845 = vmatprep.mubr.msk.f32.mxu1 %vm2004_vm0, %v2003_v0  ;;  %s169_s28 = scalar_lea.vmem %s2288_s1, %s1767_s25  ;;  %1939 = vset.pattern.permute.xlu0 %v2011_v4  ;;  %v2126_v7 = vand.u32 127, %v184_v6  ;;  %v1791_v39 = vld [vmem:[%s2287_s0 + $0x20] sm:$0xff]  ;;  %v1797_v44 = vld [vmem:[%s2287_s0 + $0x28] sm:$0xff]  ;;  %v1803_v50 = vld [vmem:[%s2287_s0 + $0x30] sm:$0xff]  ;;  %s1888_s19 = smul.u32 24, %s162_s17 }
  0x16   : > { %v2091_v1 = vld [vmem:[%s169_s28 + $0x8] sm:$0xf]  ;;  %v2093_v2 = vld [vmem:[%s169_s28] sm:$0xff]  ;;  %v1809_v56 = vld [vmem:[%s2287_s0 + $0x38] sm:$0xff]  ;;  %s1824_s20 = smul.u32 384, %s2056_s16  ;;  %s2014_s16 = smov [#allocation2]  }
  0x17   : > { %195 = vrot.lane.b32.xlu1 %v2091_v1, %s2005_s29  ;;  %191 = vrot.lane.b32.xlu0 %v2093_v2, %s2005_s29  ;;  %v2099_v3 = vcombine.high %v2093_v2, %v2093_v2  ;;  %vm197_vm1 = vcmp.lt.s32.totalorder %v2126_v7, 18  ;;  %vm186_vm4 = vcmp.lt.s32.totalorder %v2126_v7, 19  ;;  %vm517_vm5 = vcmp.lt.s32.totalorder %v2126_v7, 17  ;;  %v1815_v61 = vld [vmem:[%s2287_s0 + $0x40] sm:$0xff]  ;;  %s164_s24 = scalar_lea.vmem [#allocation2], %s1888_s19 }
  0x18   : > { %vm685_vm6 = vcmp.lt.s32.totalorder %v2126_v7, 1  ;;  %vm1008_vm7 = vcmp.lt.s32.totalorder %v2126_v7, 127  ;;  %vm1176_vm8 = vcmp.lt.s32.totalorder %v2126_v7, 111  ;;  %vm1344_vm9 = vcmp.lt.s32.totalorder %v2126_v7, 110  ;;  %s1704_s25 = sshll.u32 %s164_s24, 4  ;;  %s1702_s28 = scalar_lea.hbm %s2290_s3, %s1824_s20  ;;  %s1705_s25 = int_to_ptr.vmem [resolvable:$true] %s1704_s25 }
  0x19   : > { %vm1512_vm10 = vcmp.lt.s32.totalorder %v2126_v7, 109 }
  0x1b   : > { %178 = vrot.lane.b32.xlu1 %v2093_v2, %s2006_s30  ;;  %193 = vrot.lane.b32.xlu0 %v2099_v3, %s2005_s29  ;;  %s1690_s29 = scalar_lea.sflag [#allocation3], %s162_s17 }
  0x1f   : > { %182 = vrot.lane.b32.xlu1 %v2091_v1, %s2006_s30  ;;  %180 = vrot.lane.b32.xlu0 %v2099_v3, %s2006_s30  ;;  %s1941_s30 = scalar_lea.vmem %s1705_s25, 384 }
  0x20   : > { %p1942_p11 = scmp.ne.s32.totalorder %s1705_s25, %s1941_s30 }
  0x22   : > { %p1943_p12 = pnand %p1942_p11, %p2073_p5 }
  0x23   : > { %513 = vrot.lane.b32.xlu1 %v2099_v3, %s2007_s4  ;;  %511 = vrot.lane.b32.xlu0 %v2093_v2, %s2007_s4 }
  0x24   : > { %p1944_p13 = pneg %p1943_p12 }
  0x27   : > { %679 = vrot.lane.b32.xlu1 %v2093_v2, %s2008_s5  ;;  %515 = vrot.lane.b32.xlu0 %v2091_v1, %s2007_s4  ;;  %s1945_s4 = sshll.u32 %s2014_s16, 4  ;;  %s1946_s4 = int_to_ptr.vmem [resolvable:$false] %s1945_s4 }
  0x28   : > { %p1948_p0 = scmp.lt.s32.totalorder %s1705_s25, %s1946_s4 }
  0x2b   : > { %683 = vrot.lane.b32.xlu1 %v2091_v1, %s2008_s5  ;;  %681 = vrot.lane.b32.xlu0 %v2099_v3, %s2008_s5  ;;  %s1947_s5 = scalar_lea.vmem %s1946_s4, 768 }
  0x2c   : > { %p1949_p1 = scmp.lt.s32.totalorder %s1947_s5, %s1941_s30 }
  0x2e   : > { %p1950_p2 = por %p1949_p1, %p1948_p0 }
  0x2f   : > { %1006 = vrot.lane.b32.xlu1 %v2091_v1, %s2009_s6  ;;  %1004 = vrot.lane.b32.xlu0 %v2099_v3, %s2009_s6 }
  0x30   : > { %p1951_p3 = pnand %p1950_p2, %p1944_p13 }
  0x33   : > { %1172 = vrot.lane.b32.xlu1 %v2099_v3, %s2010_s7  ;;  %1002 = vrot.lane.b32.xlu0 %v2093_v2, %s2009_s6 }
  0x37   : > { %1170 = vrot.lane.b32.xlu1 %v2093_v2, %s2010_s7  ;;  %1174 = vrot.lane.b32.xlu0 %v2091_v1, %s2010_s7 }
  0x3b   : > { %1342 = vrot.lane.b32.xlu1 %v2091_v1, %s2012_s8  ;;  %1340 = vrot.lane.b32.xlu0 %v2099_v3, %s2012_s8 }
  0x3f   : > { %1508 = vrot.lane.b32.xlu1 %v2099_v3, %s2013_s9  ;;  %1338 = vrot.lane.b32.xlu0 %v2093_v2, %s2012_s8 }
  0x43   : > { %1506 = vrot.lane.b32.xlu1 %v2093_v2, %s2013_s9  ;;  %1510 = vrot.lane.b32.xlu0 %v2091_v1, %s2013_s9 }
  0x47   : > { %1677 = vperm.xlu0 %1939, %v1674_v5  }
  0x89   : > { %v196_v8 = vpop.permute.xlu1 %195  ;;  %v192_v9 = vpop.permute.xlu0 %191 }
  0x8a   : > { %v200_v15 = vsel %vm197_vm1, %v196_v8, %v192_v9 }
  0x8d   : > { %v179_v10 = vpop.permute.xlu1 %178  ;;  %v194_v11 = vpop.permute.xlu0 %193 }
  0x8e   : > { %v199_v12 = vsel %vm197_vm1, %v192_v9, %v194_v11  ;;  %v198_v13 = vsel %vm197_vm1, %v194_v11, %v196_v8 }
  0x8f   : > { %1769 = vmatprep.subr.msk.mxu0 %vm207_vm2, %v199_v12  ;;  %1844 = vmatpush3.msk.msra.mxu1 %vm207_vm2, %v198_v13 }
  0x90   : > { %1770 = vmatpush1.msk.msra.mxu0 %vm207_vm2, %v200_v15  ;;  %1848 = vmatprep.subr.mxu1 %v2003_v0 }
  0x91   : > { %v183_v16 = vpop.permute.xlu1 %182  ;;  %v181_v17 = vpop.permute.xlu0 %180  ;;  %1846 = vmatmul.mubr.msk.f32.vlgmr.msra.gmra.mxu1 %vm203_vm3, %v1768_v14  ;;  %1771 = vmatmul.mubr.msk.f32.vlgmr.msra.gmra.mxu0 %vm203_vm3, %v1768_v14 }
  0x92   : > { %v189_v18 = vsel %vm186_vm4, %v183_v16, %v179_v10  ;;  %v187_v19 = vsel %vm186_vm4, %v181_v17, %v183_v16  ;;  %v188_v20 = vsel %vm186_vm4, %v179_v10, %v181_v17  ;;  %434 = vmatprep.mubr.f32.mxu0 %v2003_v0  ;;  %1850 = vmatprep.mubr.msk.f32.mxu1 %vm2004_vm0, %v2003_v0 }
  0x93   : > { %1774 = vmatprep.subr.msk.mxu0 %vm207_vm2, %v188_v20  ;;  %1849 = vmatpush3.msk.msra.mxu1 %vm207_vm2, %v187_v19 }
  0x94   : > { %1775 = vmatpush1.msk.msra.mxu0 %vm207_vm2, %v189_v18  ;;  %1853 = vmatprep.subr.mxu1 %v2003_v0 }
  0x95   : > { %v514_v22 = vpop.permute.xlu1 %513  ;;  %v512_v23 = vpop.permute.xlu0 %511  ;;  %1776 = vmatmul.mubr.msk.f32.vlgmr.msra.gmra.mxu0 %vm203_vm3, %v190_v21  ;;  %1851 = vmatmul.mubr.msk.f32.vlgmr.msra.gmra.mxu1 %vm203_vm3, %v190_v21 }
  0x96   : > { %v519_v24 = vsel %vm517_vm5, %v512_v23, %v514_v22  ;;  %599 = vmatprep.mubr.f32.mxu0 %v2003_v0  ;;  %1855 = vmatprep.mubr.msk.f32.mxu1 %vm2004_vm0, %v2003_v0 }
  0x97   : > { %1780 = vmatprep.subr.msk.mxu0 %vm207_vm2, %v519_v24 }
  0x99   : > { %v680_v25 = vpop.permute.xlu1 %679  ;;  %v516_v26 = vpop.permute.xlu0 %515 }
  0x9a   : > { %v518_v28 = vsel %vm517_vm5, %v514_v22, %v516_v26  ;;  %v520_v29 = vsel %vm517_vm5, %v516_v26, %v512_v23 }
  0x9b   : > { %1781 = vmatpush1.msk.msra.mxu0 %vm207_vm2, %v520_v29  ;;  %1854 = vmatpush3.msk.msra.mxu1 %vm207_vm2, %v518_v28 }
  0x9c   : > { %1782 = vmatmul.mubr.msk.f32.vlgmr.msra.gmra.mxu0 %vm203_vm3, %v1779_v27  ;;  %1856 = vmatmul.mubr.msk.f32.vlgmr.msra.gmra.mxu1 %vm203_vm3, %v1779_v27 }
  0x9d   : > { %v684_v30 = vpop.permute.xlu1 %683  ;;  %v682_v31 = vpop.permute.xlu0 %681  ;;  %1858 = vmatprep.subr.mxu1 %v2003_v0  ;;  %1860 = vmatprep.mubr.msk.f32.mxu1 %vm2004_vm0, %v2003_v0 }
  0x9e   : > { %v688_v33 = vsel %vm685_vm6, %v684_v30, %v680_v25  ;;  %v686_v34 = vsel %vm685_vm6, %v682_v31, %v684_v30  ;;  %v687_v35 = vsel %vm685_vm6, %v680_v25, %v682_v31  ;;  %767 = vmatprep.mubr.f32.mxu0 %v2003_v0 }
  0x9f   : > { %1786 = vmatprep.subr.msk.mxu0 %vm207_vm2, %v687_v35  ;;  %1859 = vmatpush3.msk.msra.mxu1 %vm207_vm2, %v686_v34 }
  0xa0   : > { %1787 = vmatpush1.msk.msra.mxu0 %vm207_vm2, %v688_v33  ;;  %1861 = vmatmul.mubr.msk.f32.vlgmr.msra.gmra.mxu1 %vm203_vm3, %v1785_v32 }
  0xa1   : > { %v1007_v36 = vpop.permute.xlu1 %1006  ;;  %1788 = vmatmul.mubr.msk.f32.vlgmr.msra.gmra.mxu0 %vm203_vm3, %v1785_v32  ;;  %1792 = vmatprep.subr.msk.mxu0 %vm207_vm2, %v2099_v3  ;;  %v1005_v37 = vpop.permute.xlu0 %1004 }
  0xa2   : > { %v1009_v38 = vsel %vm1008_vm7, %v1005_v37, %v1007_v36  ;;  %1793 = vmatpush1.msk.msra.mxu0 %vm207_vm2, %v2093_v2  ;;  %1863 = vmatprep.subr.mxu1 %v2003_v0 }
  0xa3   : > { %1864 = vmatpush3.msk.msra.mxu1 %vm207_vm2, %v2091_v1  ;;  %1865 = vmatprep.mubr.msk.f32.mxu1 %vm2004_vm0, %v2003_v0 }
  0xa4   : > { %1798 = vmatprep.subr.msk.mxu0 %vm207_vm2, %v1009_v38  ;;  %922 = vmatprep.mubr.f32.mxu0 %v2003_v0 }
  0xa5   : > { %1866 = vmatmul.mubr.msk.f32.vlgmr.msra.gmra.mxu1 %vm203_vm3, %v1791_v39  ;;  %v1173_v40 = vpop.permute.xlu1 %1172  ;;  %1794 = vmatmul.mubr.msk.f32.vlgmr.msra.gmra.mxu0 %vm203_vm3, %v1791_v39  ;;  %v1003_v41 = vpop.permute.xlu0 %1002 }
  0xa6   : > { %v1010_v42 = vsel %vm1008_vm7, %v1003_v41, %v1005_v37  ;;  %v1011_v43 = vsel %vm1008_vm7, %v1007_v36, %v1003_v41  ;;  %1868 = vmatprep.subr.mxu1 %v2003_v0  ;;  %1870 = vmatprep.mubr.msk.f32.mxu1 %vm2004_vm0, %v2003_v0 }
  0xa7   : > { %1799 = vmatpush1.msk.msra.mxu0 %vm207_vm2, %v1010_v42  ;;  %1869 = vmatpush3.msk.msra.mxu1 %vm207_vm2, %v1011_v43 }
  0xa8   : > { %1090 = vmatprep.mubr.f32.mxu0 %v2003_v0  ;;  %1873 = vmatprep.subr.mxu1 %v2003_v0 }
  0xa9   : > { %1871 = vmatmul.mubr.msk.f32.vlgmr.msra.gmra.mxu1 %vm203_vm3, %v1797_v44  ;;  %v1171_v45 = vpop.permute.xlu1 %1170  ;;  %1800 = vmatmul.mubr.msk.f32.vlgmr.msra.gmra.mxu0 %vm203_vm3, %v1797_v44  ;;  %v1175_v46 = vpop.permute.xlu0 %1174 }
  0xaa   : > { %v1178_v47 = vsel %vm1176_vm8, %v1171_v45, %v1173_v40  ;;  %v1177_v48 = vsel %vm1176_vm8, %v1173_v40, %v1175_v46  ;;  %v1179_v49 = vsel %vm1176_vm8, %v1175_v46, %v1171_v45  ;;  %1875 = vmatprep.mubr.msk.f32.mxu1 %vm2004_vm0, %v2003_v0  ;;  %1258 = vmatprep.mubr.f32.mxu0 %v2003_v0 }
  0xab   : > { %1804 = vmatprep.subr.msk.mxu0 %vm207_vm2, %v1177_v48  ;;  %1874 = vmatpush3.msk.msra.mxu1 %vm207_vm2, %v1179_v49 }
  0xac   : > { %1805 = vmatpush1.msk.msra.mxu0 %vm207_vm2, %v1178_v47  ;;  %1878 = vmatprep.subr.mxu1 %v2003_v0 }
  0xad   : > { %1876 = vmatmul.mubr.msk.f32.vlgmr.msra.gmra.mxu1 %vm203_vm3, %v1803_v50  ;;  %v1343_v51 = vpop.permute.xlu1 %1342  ;;  %1806 = vmatmul.mubr.msk.f32.vlgmr.msra.gmra.mxu0 %vm203_vm3, %v1803_v50  ;;  %v1341_v52 = vpop.permute.xlu0 %1340 }
  0xae   : > { %v1345_v53 = vsel %vm1344_vm9, %v1341_v52, %v1343_v51  ;;  %1426 = vmatprep.mubr.f32.mxu0 %v2003_v0  ;;  %1880 = vmatprep.mubr.msk.f32.mxu1 %vm2004_vm0, %v2003_v0 }
  0xaf   : > { %1810 = vmatprep.subr.msk.mxu0 %vm207_vm2, %v1345_v53 }
  0xb1   : > { %v1509_v54 = vpop.permute.xlu1 %1508  ;;  %v1339_v55 = vpop.permute.xlu0 %1338 }
  0xb2   : > { %v1346_v57 = vsel %vm1344_vm9, %v1339_v55, %v1341_v52  ;;  %v1347_v58 = vsel %vm1344_vm9, %v1343_v51, %v1339_v55 }
  0xb3   : > { %1811 = vmatpush1.msk.msra.mxu0 %vm207_vm2, %v1346_v57  ;;  %1879 = vmatpush3.msk.msra.mxu1 %vm207_vm2, %v1347_v58 }
  0xb4   : > { %1812 = vmatmul.mubr.msk.f32.vlgmr.msra.gmra.mxu0 %vm203_vm3, %v1809_v56  ;;  %1881 = vmatmul.mubr.msk.f32.vlgmr.msra.gmra.mxu1 %vm203_vm3, %v1809_v56 }
  0xb5   : > { %v1507_v59 = vpop.permute.xlu1 %1506  ;;  %v1511_v60 = vpop.permute.xlu0 %1510  ;;  %1883 = vmatprep.subr.mxu1 %v2003_v0  ;;  %1885 = vmatprep.mubr.msk.f32.mxu1 %vm2004_vm0, %v2003_v0 }
  0xb6   : > { %v1514_v62 = vsel %vm1512_vm10, %v1507_v59, %v1509_v54  ;;  %v1513_v63 = vsel %vm1512_vm10, %v1509_v54, %v1511_v60  ;;  %v1515_v1 = vsel %vm1512_vm10, %v1511_v60, %v1507_v59  ;;  %1594 = vmatprep.mubr.f32.mxu0 %v2003_v0 }
  0xb7   : > { %1816 = vmatprep.subr.msk.mxu0 %vm207_vm2, %v1513_v63  ;;  %1884 = vmatpush3.msk.msra.mxu1 %vm207_vm2, %v1515_v1 }
  0xb8   : > { %1817 = vmatpush1.msk.msra.mxu0 %vm207_vm2, %v1514_v62  ;;  %1886 = vmatmul.mubr.msk.f32.vlgmr.msra.gmra.mxu1 %vm203_vm3, %v1815_v61 }
  0xb9   : > { %1818 = vmatmul.mubr.msk.f32.vlgmr.msra.gmra.mxu0 %vm203_vm3, %v1815_v61 }
  0xc2   : > { %v1678_v54 = vpop.permute.xlu0 %1677 }
 0x151   : > { %v283_v2 = vpop.f32.mrf.mxu0  ;;  %v354_v3 = vpop.f32.mrf.mxu1 }
 0x153   : > { %v285_v4 = vpop.f32.mrf.mxu0  ;;  %v1847_v5 = vpop.f32.mrf.mxu1 }
 0x155   : > { %v436_v6 = vpop.f32.mrf.mxu0  ;;  %v507_v7 = vpop.f32.mrf.mxu1 }
 0x156   : > { %v508_v19 = vadd.f32 %v507_v7, %v354_v3  ;;  %v437_v24 = vadd.f32 %v436_v6, %v283_v2 }
 0x157   : > { %v1852_v8 = vpop.f32.mrf.mxu1  ;;  %v438_v9 = vpop.f32.mrf.mxu0 }
 0x158   : > { %v439_v29 = vadd.f32 %v438_v9, %v285_v4 }
 0x15c   : > { %v601_v10 = vpop.f32.mrf.mxu0  ;;  %v672_v0 = vpop.f32.mrf.mxu1 }
 0x15d   : > { %v678_v25 = vadd.f32 %v672_v0, %v508_v19  ;;  %v676_v30 = vadd.f32 %v601_v10, %v437_v24 }
 0x15e   : > { %v603_v11 = vpop.f32.mrf.mxu0  ;;  %v1857_v12 = vpop.f32.mrf.mxu1 }
 0x15f   : > { %v677_v34 = vadd.f32 %v603_v11, %v439_v29 }
 0x160   : > { %v840_v13 = vpop.f32.mrf.mxu1 }
 0x161   : > { %v769_v14 = vpop.f32.mrf.mxu0  ;;  %v846_v32 = vadd.f32 %v840_v13, %v678_v25 }
 0x162   : > { %v1862_v15 = vpop.f32.mrf.mxu1  ;;  %v844_v35 = vadd.f32 %v769_v14, %v676_v30 }
 0x163   : > { %v771_v16 = vpop.f32.mrf.mxu0 }
 0x164   : > { %v845_v37 = vadd.f32 %v771_v16, %v677_v34 }
 0x165   : > { %v995_v17 = vpop.f32.mrf.mxu1  ;;  %v924_v18 = vpop.f32.mrf.mxu0 }
 0x166   : > { %v1001_v36 = vadd.f32 %v995_v17, %v846_v32  ;;  %v999_v38 = vadd.f32 %v924_v18, %v844_v35 }
 0x167   : > { %v1867_v20 = vpop.f32.mrf.mxu1  ;;  %v926_v21 = vpop.f32.mrf.mxu0 }
 0x168   : > { %v1000_v41 = vadd.f32 %v926_v21, %v845_v37 }
 0x169   : > { %v1163_v22 = vpop.f32.mrf.mxu1  ;;  %v1092_v23 = vpop.f32.mrf.mxu0 }
 0x16a   : > { %v1169_v40 = vadd.f32 %v1163_v22, %v1001_v36  ;;  %v1167_v42 = vadd.f32 %v1092_v23, %v999_v38 }
 0x16b   : > { %v1872_v26 = vpop.f32.mrf.mxu1  ;;  %v1094_v27 = vpop.f32.mrf.mxu0 }
 0x16c   : > { %v1168_v46 = vadd.f32 %v1094_v27, %v1000_v41 }
 0x16d   : > { %v1331_v28 = vpop.f32.mrf.mxu1  ;;  %v1260_v31 = vpop.f32.mrf.mxu0 }
 0x16e   : > { %v1337_v45 = vadd.f32 %v1331_v28, %v1169_v40  ;;  %v1335_v47 = vadd.f32 %v1260_v31, %v1167_v42 }
 0x16f   : > { %v1877_v33 = vpop.f32.mrf.mxu1  ;;  %v1262_v39 = vpop.f32.mrf.mxu0 }
 0x170   : > { %v1336_v51 = vadd.f32 %v1262_v39, %v1168_v46 }
 0x174   : > { %v1428_v43 = vpop.f32.mrf.mxu0  ;;  %v1499_v44 = vpop.f32.mrf.mxu1 }
 0x175   : > { %v1505_v50 = vadd.f32 %v1499_v44, %v1337_v45  ;;  %v1503_v52 = vadd.f32 %v1428_v43, %v1335_v47 }
 0x176   : > { %v1430_v48 = vpop.f32.mrf.mxu0  ;;  %v1882_v49 = vpop.f32.mrf.mxu1 }
 0x177   : > { %v1504_v57 = vadd.f32 %v1430_v48, %v1336_v51 }
 0x178   : > { %v1667_v53 = vpop.f32.mrf.mxu1 }
 0x179   : > { %v1673_v55 = vadd.f32 %v1667_v53, %v1505_v50  ;;  %v1596_v56 = vpop.f32.mrf.mxu0 }
 0x17a   : > { %v1671_v58 = vadd.f32 %v1596_v56, %v1503_v52  ;;  %v1887_v59 = vpop.f32.mrf.mxu1 }
 0x17b   : > { %v1682_v60 = vadd.f32 %v1678_v54, %v1673_v55  ;;  %v1598_v61 = vpop.f32.mrf.mxu0 }
 0x17c   : > { %v1680_v62 = vadd.f32 %v1678_v54, %v1671_v58  ;;  %v1672_v63 = vadd.f32 %v1598_v61, %v1504_v57 }
 0x17d   : > { %v1685_v1 = vmax.f32 %v1682_v60, 0.0 }
 0x17e   : > { %v1683_v2 = vmax.f32 %v1680_v62, 0.0  ;;  %v1681_v3 = vadd.f32 %v1678_v54, %v1672_v63 }
 0x17f   : > { %1688 = vst [vmem:[%s164_s24 + $0x10] sm:$0xff] %v1685_v1 }
 0x180   : > { %1686 = vst [vmem:[%s164_s24] sm:$0xff] %v1683_v2  ;;  %v1684_v4 = vmax.f32 %v1681_v3, 0.0 }
 0x182   : > { %1687 = vst [vmem:[%s164_s24 + $0x8] sm:$0xff] %v1684_v4 }
 0x183   : > { %1954 = shalt.err (!%p1951_p3)
}
 0x184   : > { %s1955_s6 = scalar_lea.hbm %s1702_s28, 384  ;;  %s1959_s9 = scalar_lea.hbm %s2290_s3, 768 }
 0x185   : > { %p1956_p4 = scmp.ne.s32.totalorder %s1702_s28, %s1955_s6  ;;  %p1960_p9 = scmp.lt.s32.totalorder %s1702_s28, %s2290_s3 }
 0x186   : > { %p1961_p10 = scmp.lt.s32.totalorder %s1959_s9, %s1955_s6 }
 0x187   : > { %p1957_p7 = pnand %p1956_p4, %p2073_p5 }
 0x188   : > { %p1962_p11 = por %p1961_p10, %p1960_p9 }
 0x189   : > { %p1958_p8 = pneg %p1957_p7 }
 0x18b   : > { %p1963_p12 = pnand %p1962_p11, %p1958_p8 }
 0x18d   : > { %1966 = shalt.err (!%p1963_p12)
}
 0x18e   : > { %1889 = dma.vmem_to_hbm [thread:$0]  (%p2073_p5), %s1705_s25, 384, %s1702_s28, %s1690_s29  }
 0x18f PF: > { %p1895_p13 = scmp.ge.s32.totalorder %s2001_s15, 2  ;;  %s1716_s17 = sand.u32 1, %s1989_s12  }
 0x190   : > { %s1717_s19 = scalar_lea.sflag [#allocation3], %s1716_s17 }
 0x191   : > { %p1892_p0 = pnand %p1895_p13, %p2077_p6 }
 0x193   : > { %p1893_p1 = pneg %p1892_p0 }
 0x195   : > { %1984 = dma.done.wait (%p1893_p1), %s1717_s19, 384  }
 0x196   : > { %1986 = vsyncadd (%p1893_p1), %s1717_s19, 4294966912  ;;  %p13_p2 = scmp.ge.s32.totalorder %s2060_s18, 4   ;;  %s2293_s12 = smov %s1993_s13 }
 0x197   : > { %s2294_s13 = smov %s1997_s14  ;;  %s2295_s14 = smov %s2071_s21 }
 0x198   : > { %s2296_s15 = smov %s2060_s18  ;;  %15 = sbr.rel (!%p13_p2) target bundleno = 3 (0x3), region = 75 }
 0x19d   :  { %1722 = vsyncpa [#allocation3], 1 }
 0x19e   :  { %1724 = vsyncpa [#allocation3 + $0x1], 1 }

</bundles_post_ra>
